<compile_context>
chip_gen: v5e
topology: v5e:2x2
jax: 0.10.0
libtpu: 0.0.40
codegen_flags: <defaults>
</compile_context>

<pallas_src>
import functools

import jax
import jax.numpy as jnp
from jax import lax
from jax.experimental import pallas as pl
from jax.experimental.pallas import tpu as pltpu


def _ce_kernel(logits_ref, labels_ref, out_ref,
               *, label_smoothing: float, ignore_index: int, vocab: int, n_rows: int):
    x = logits_ref[...]                              # (TM, V) in the caller's dtype (bf16 ok)
    lbl = labels_ref[...]                            # (TM, 1) int32
    tm = x.shape[0]

    # Row max and true-class gather in the raw dtype (exact: max / select of input
    # values); only the (TM, 1) results are widened to f32.
    m_raw = jnp.max(x, axis=-1, keepdims=True)                         # (TM, 1)
    col = lax.broadcasted_iota(jnp.int32, x.shape, 1)
    onehot = col == lbl
    x_true = jnp.sum(jnp.where(onehot, x, 0.0), axis=-1, keepdims=True)  # exact (one nonzero)

    m = m_raw.astype(jnp.float32)
    xs = x.astype(jnp.float32) - m                   # (TM, V) f32 — only full-size f32 temp
    sum_exp = jnp.sum(jnp.exp(xs), axis=-1, keepdims=True)             # (TM, 1)
    lse_s = jnp.log(sum_exp)                         # = logsumexp - m

    nll = lse_s - (x_true.astype(jnp.float32) - m)   # -log p_target (shift m cancels)

    ls = float(label_smoothing)
    if ls != 0.0:
        # mean_c(-log p_c) = lse - mean_c(x_c)
        if x.dtype == jnp.bfloat16:
            # Offload the full-row sum to the (otherwise idle) MXU; bf16 x bf16 -> f32 acc
            # is exact for selecting/summing the already-bf16 input values.
            ones = jnp.ones((vocab, 1), dtype=x.dtype)
            sum_x = jnp.dot(x, ones, preferred_element_type=jnp.float32)   # (TM, 1)
            mean_xs = sum_x * (1.0 / float(vocab)) - m                     # mean(x) - m
        else:
            # f32 inputs (and v5e, no bf16 VALU): keep the exact f32 VALU reduction.
            mean_xs = jnp.sum(xs, axis=-1, keepdims=True) * (1.0 / float(vocab))
        per_row = (1.0 - ls) * nll + ls * (lse_s - mean_xs)
    else:
        per_row = nll                                # statically drop the smoothing pass

    # Mask tail rows of the (possibly partial) boundary block and ignored labels.
    # jnp.where (not multiply) so garbage tail logits can't poison the tile sum.
    row = lax.broadcasted_iota(jnp.int32, (tm, 1), 0) + pl.program_id(0) * tm
    valid = (row < n_rows) & (lbl != ignore_index)
    tile_sum = jnp.sum(jnp.where(valid, per_row, 0.0))
    tile_cnt = jnp.sum(valid.astype(jnp.float32))

    # Single lane-dense (8,128) partial block: sublane 0 = sum, sublane 1 = count.
    sub = lax.broadcasted_iota(jnp.int32, (8, 128), 0)
    partial = jnp.where(sub == 0, tile_sum, jnp.where(sub == 1, tile_cnt, 0.0))
    out_ref[...] = partial.reshape(out_ref.shape)


def _round_up(x: int, m: int) -> int:
    return (x + m - 1) // m * m


def _pick_tile_and_vmem(n_rows: int, vocab: int, itemsize: int):
    """Row tile + scoped-VMEM limit from one consistent per-row byte model."""
    try:
        vmem_cap = int(pltpu.get_tpu_info().vmem_capacity_bytes)
    except Exception:
        vmem_cap = 64 * 1024 * 1024          # conservative fallback (v7x per-TC)

    # Working-set budget: ~40% of physical VMEM (~48 MiB on v5e/v6e, ~25 MiB on v7x).
    budget = max(8 << 20, min(int(vmem_cap * 0.4), 48 << 20))

    # Per-row bytes: 2x double-buffered input block + ~5 f32-sized (TM, V)
    # temporaries the kernel can materialize (xs, exp(xs), iota, onehot, select).
    per_row = vocab * (2 * itemsize + 5 * 4) + 64

    tm = budget // per_row
    tm = max(16, (tm // 16) * 16)            # sublane multiple (covers bf16 packing)
    if n_rows >= 32:
        # At least 2 grid tiles so ("parallel",) shards across v7x's two TensorCores.
        tm = min(tm, _round_up((n_rows + 1) // 2, 16))
    tm = min(tm, _round_up(n_rows, 16))
    tm = max(tm, 16)
    # TODO(synk): vocab >= ~32K on v7x needs the vocab-chunked online-logsumexp path;
    # the tm floor here can still exceed 64 MiB VMEM for 128K+ class vocabularies.

    vmem_limit = per_row * tm + (4 << 20)    # same model as the tile choice + headroom
    vmem_limit = int(max(16 << 20, min(vmem_limit, int(vmem_cap * 0.75))))
    return tm, vmem_limit


def base_loss(logits, labels, *, label_smoothing: float = 0.0):
    """Equivalent of BaseLoss.forward(logits, labels): mean CE, ignore_index=0."""
    vocab = logits.shape[-1]
    logits2 = logits.reshape(-1, vocab)              # keep caller dtype (bf16 halves HBM traffic)
    labels2 = labels.reshape(-1).astype(jnp.int32).reshape(-1, 1)
    n = logits2.shape[0]

    itemsize = jnp.dtype(logits2.dtype).itemsize
    tm, vmem_limit = _pick_tile_and_vmem(n, vocab, itemsize)
    num_tiles = pl.cdiv(n, tm)

    kernel = functools.partial(_ce_kernel,
                               label_smoothing=float(label_smoothing),
                               ignore_index=0, vocab=vocab, n_rows=n)

    out = pl.pallas_call(
        kernel,
        out_shape=jax.ShapeDtypeStruct((num_tiles, 8, 128), jnp.float32),
        grid_spec=pltpu.PrefetchScalarGridSpec(
            num_scalar_prefetch=0,
            grid=(num_tiles,),
            in_specs=[
                pl.BlockSpec((tm, vocab), lambda i: (i, 0)),
                pl.BlockSpec((tm, 1), lambda i: (i, 0)),
            ],
            out_specs=pl.BlockSpec((1, 8, 128), lambda i: (i, 0, 0)),
        ),
        compiler_params=pltpu.CompilerParams(
            dimension_semantics=("parallel",),       # independent per-tile partials
            vmem_limit_bytes=vmem_limit),
    )(logits2, labels2)

    total_sum = jnp.sum(out[:, 0, 0])
    total_cnt = jnp.sum(out[:, 1, 0])
    # mean over non-ignored rows (NaN if everything is ignored, same as torch)
    return total_sum / total_cnt


def _reference_loss(logits, labels, label_smoothing=0.0, ignore_index=0):
    """Plain-JAX reference matching torch.nn.CrossEntropyLoss semantics."""
    V = logits.shape[-1]
    x = logits.reshape(-1, V).astype(jnp.float32)
    y = labels.reshape(-1).astype(jnp.int32)
    logp = jax.nn.log_softmax(x, axis=-1)
    nll = -jnp.take_along_axis(logp, y[:, None], axis=-1)[:, 0]
    smooth = -jnp.mean(logp, axis=-1)
    per_row = (1.0 - label_smoothing) * nll + label_smoothing * smooth
    valid = (y != ignore_index).astype(jnp.float32)
    return jnp.sum(per_row * valid) / jnp.sum(valid)


if __name__ == "__main__":
    # NOTE: BaseLoss has no learnable parameters, so there is nothing to initialize.
    key = jax.random.PRNGKey(0)
    k1, k2 = jax.random.split(key)

    batch, seq, vocab = 2, 8, 128
    logits = jax.random.normal(k1, (batch, seq, vocab), dtype=jnp.float32)
    labels = jax.random.randint(k2, (batch, seq), 0, vocab, dtype=jnp.int32)
    labels = labels.at[0, 0].set(0)   # exercise the ignore_index=0 path

    ok = True
    for ls in (0.0, 0.1):
        out = jax.block_until_ready(base_loss(logits, labels, label_smoothing=ls))
        ref = _reference_loss(logits, labels, label_smoothing=ls)
        if not jnp.allclose(out, ref, atol=1e-5, rtol=1e-5):
            ok = False
            print(f"MISMATCH f32 ls={ls}: kernel={out} ref={ref}")

    # bf16 logits + row count that is NOT a multiple of the tile: exercises the
    # unpadded partial boundary block, the in-kernel tail mask, the >=2-tile split,
    # and the bf16 MXU smoothing-reduction path.
    k3, k4 = jax.random.split(k1)
    logits_r = jax.random.normal(k3, (3, 37, vocab), dtype=jnp.float32).astype(jnp.bfloat16)
    labels_r = jax.random.randint(k4, (3, 37), 0, vocab, dtype=jnp.int32)
    out = jax.block_until_ready(base_loss(logits_r, labels_r, label_smoothing=0.1))
    ref = _reference_loss(logits_r, labels_r, label_smoothing=0.1)
    if not jnp.allclose(out, ref, atol=1e-3, rtol=1e-3):
        ok = False
        print(f"MISMATCH bf16: kernel={out} ref={ref}")

    if ok:
        print("KERNEL_OK")
</pallas_src>

<mosaic_0001>
module attributes {stable_mosaic.version = 11 : i64} {
  func.func @_ce_kernel(%arg0: i32, %arg1: memref<16x128xf32, #tpu.memory_space<vmem>>, %arg2: memref<16x1xi32, #tpu.memory_space<vmem>>, %arg3: memref<1x8x128xf32, #tpu.memory_space<vmem>>) attributes {dimension_semantics = [#tpu.dimension_semantics<parallel>], iteration_bounds = array<i64: 1>, scalar_prefetch = 0 : i64, scratch_operands = 0 : i64, tpu.core_type = #tpu.core_type<tc>, window_params = [{transform_indices = @transform_0, window_bounds = array<i64: 16, 128>}, {transform_indices = @transform_1, window_bounds = array<i64: 16, 1>}, {transform_indices = @transform_2, window_bounds = array<i64: 1, 8, 128>}]} {
    %c0 = arith.constant 0 : index
    %c0_0 = arith.constant 0 : index
    %0 = vector.load %arg1[%c0, %c0_0] : memref<16x128xf32, #tpu.memory_space<vmem>>, vector<16x128xf32>
    %c0_1 = arith.constant 0 : index
    %c0_2 = arith.constant 0 : index
    %1 = vector.load %arg2[%c0_1, %c0_2] : memref<16x1xi32, #tpu.memory_space<vmem>>, vector<16x1xi32>
    %cst = arith.constant dense<0xFF800000> : vector<16xf32>
    %2 = vector.multi_reduction <maximumf>, %0, %cst [1] : vector<16x128xf32> to vector<16xf32>
    %3 = vector.shape_cast %2 : vector<16xf32> to vector<16x1xf32>
    %4 = tpu.iota {dimensions = array<i32: 1>} : vector<16x128xi32>
    %5 = vector.broadcast %1 : vector<16x1xi32> to vector<16x128xi32>
    %6 = arith.cmpi eq, %4, %5 : vector<16x128xi32>
    %cst_3 = arith.constant 0.000000e+00 : f32
    %7 = vector.broadcast %cst_3 : f32 to vector<16x128xf32>
    %8 = arith.select %6, %0, %7 : vector<16x128xi1>, vector<16x128xf32>
    %cst_4 = arith.constant dense<0.000000e+00> : vector<16xf32>
    %9 = vector.multi_reduction <add>, %8, %cst_4 [1] : vector<16x128xf32> to vector<16xf32>
    %10 = vector.shape_cast %9 : vector<16xf32> to vector<16x1xf32>
    %11 = vector.broadcast %3 : vector<16x1xf32> to vector<16x128xf32>
    %12 = arith.subf %0, %11 : vector<16x128xf32>
    %13 = math.exp %12 : vector<16x128xf32>
    %cst_5 = arith.constant dense<0.000000e+00> : vector<16xf32>
    %14 = vector.multi_reduction <add>, %13, %cst_5 [1] : vector<16x128xf32> to vector<16xf32>
    %15 = vector.shape_cast %14 : vector<16xf32> to vector<16x1xf32>
    %16 = math.log %15 : vector<16x1xf32>
    %17 = arith.subf %10, %3 : vector<16x1xf32>
    %18 = arith.subf %16, %17 : vector<16x1xf32>
    %19 = tpu.iota {dimensions = array<i32: 0>} : vector<16x1xi32>
    %c16_i32 = arith.constant 16 : i32
    %20 = arith.muli %arg0, %c16_i32 : i32
    %21 = vector.broadcast %20 : i32 to vector<16x1xi32>
    %22 = arith.addi %19, %21 : vector<16x1xi32>
    %c16_i32_6 = arith.constant 16 : i32
    %23 = vector.broadcast %c16_i32_6 : i32 to vector<16x1xi32>
    %24 = arith.cmpi slt, %22, %23 : vector<16x1xi32>
    %c0_i32 = arith.constant 0 : i32
    %25 = vector.broadcast %c0_i32 : i32 to vector<16x1xi32>
    %26 = arith.cmpi ne, %1, %25 : vector<16x1xi32>
    %27 = arith.andi %24, %26 : vector<16x1xi1>
    %cst_7 = arith.constant 0.000000e+00 : f32
    %28 = vector.broadcast %cst_7 : f32 to vector<16x1xf32>
    %29 = arith.select %27, %18, %28 : vector<16x1xi1>, vector<16x1xf32>
    %30 = vector.shape_cast %29 : vector<16x1xf32> to vector<1x16x1xf32>
    %cst_8 = arith.constant dense<0.000000e+00> : vector<1xf32>
    %31 = vector.multi_reduction <add>, %30, %cst_8 [1, 2] : vector<1x16x1xf32> to vector<1xf32>
    %32 = vector.shape_cast %31 : vector<1xf32> to vector<1x1x1xf32>
    %33 = vector.extract %32[0, 0, 0] : f32 from vector<1x1x1xf32>
    %34 = arith.extui %27 : vector<16x1xi1> to vector<16x1xi32>
    %35 = arith.sitofp %34 : vector<16x1xi32> to vector<16x1xf32>
    %36 = vector.shape_cast %35 : vector<16x1xf32> to vector<1x16x1xf32>
    %cst_9 = arith.constant dense<0.000000e+00> : vector<1xf32>
    %37 = vector.multi_reduction <add>, %36, %cst_9 [1, 2] : vector<1x16x1xf32> to vector<1xf32>
    %38 = vector.shape_cast %37 : vector<1xf32> to vector<1x1x1xf32>
    %39 = vector.extract %38[0, 0, 0] : f32 from vector<1x1x1xf32>
    %40 = tpu.iota {dimensions = array<i32: 0>} : vector<8x128xi32>
    %c0_i32_10 = arith.constant 0 : i32
    %41 = vector.broadcast %c0_i32_10 : i32 to vector<8x128xi32>
    %42 = arith.cmpi eq, %40, %41 : vector<8x128xi32>
    %c1_i32 = arith.constant 1 : i32
    %43 = vector.broadcast %c1_i32 : i32 to vector<8x128xi32>
    %44 = arith.cmpi eq, %40, %43 : vector<8x128xi32>
    %cst_11 = arith.constant 0.000000e+00 : f32
    %45 = vector.broadcast %39 : f32 to vector<8x128xf32>
    %46 = vector.broadcast %cst_11 : f32 to vector<8x128xf32>
    %47 = arith.select %44, %45, %46 : vector<8x128xi1>, vector<8x128xf32>
    %48 = vector.broadcast %33 : f32 to vector<8x128xf32>
    %49 = arith.select %42, %48, %47 : vector<8x128xi1>, vector<8x128xf32>
    %50 = vector.shape_cast %49 : vector<8x128xf32> to vector<1x8x128xf32>
    %c0_12 = arith.constant 0 : index
    %c0_13 = arith.constant 0 : index
    %c0_14 = arith.constant 0 : index
    %51 = vector.load %arg3[%c0_12, %c0_13, %c0_14] : memref<1x8x128xf32, #tpu.memory_space<vmem>>, vector<1x8x128xf32>
    tpu.vector_store %arg3[%c0_12, %c0_13, %c0_14], %50 {strides = array<i32>} : memref<1x8x128xf32, #tpu.memory_space<vmem>>, vector<1x8x128xf32>,
    return
  }
  func.func @transform_0(%arg0: i32) -> (i32, i32) {
    %c0_i32 = arith.constant 0 : i32
    %c0_i32_0 = arith.constant 0 : i32
    return %arg0, %c0_i32 : i32, i32
  }
  func.func @transform_1(%arg0: i32) -> (i32, i32) {
    %c0_i32 = arith.constant 0 : i32
    %c0_i32_0 = arith.constant 0 : i32
    return %arg0, %c0_i32 : i32, i32
  }
  func.func @transform_2(%arg0: i32) -> (i32, i32, i32) {
    %c0_i32 = arith.constant 0 : i32
    %c0_i32_0 = arith.constant 0 : i32
    %c0_i32_1 = arith.constant 0 : i32
    return %arg0, %c0_i32, %c0_i32_0 : i32, i32, i32
  }
}

</mosaic_0001>

<bundles_post_ra>
// kernel: tpu_custom_call.1
= control target key start
LH: loop header
LB: loop body
LE: loop exit
PB: predicated region body
PF: predicated region fallthrough
CT: control target
= control target key end

     0   :  { %v166_v2 = vmov 0   ;;  %s209_s0 = inlined_call_operand.vmem [shape: f32[16,128], index: 0, kind: input, shape index: {}]   ;;  %s210_s1 = inlined_call_operand.vmem [shape: s32[16,1], index: 1, kind: input, shape index: {}]   ;;  %s211_s2 = inlined_call_operand.hbm [shape: f32[1,8,128], index: 2, kind: output, shape index: {}]  }
   0x1   :  { %v12_v0 = vld [vmem:[%s209_s0] sm:$0xff]  ;;  %130 = vset.pattern.permute.xlu1 %v166_v2 }
   0x2   :  { %v14_v1 = vld [vmem:[%s210_s1] sm:$0xff]  ;;  %16 = vmax.xlane.f32.xlu0 %v12_v0 }
   0x3   :  { %7 = vsyncpa [#allocation3], 0  ;;  %23 = vperm.xlu1 %130, %v14_v1   ;;  %131 = vset.pattern.permute.xlu0 %v166_v2  ;;  %v13_v3 = vld [vmem:[%s209_s0 + $0x8] sm:$0xff]  ;;  %v20_v5 = vlaneseq  ;;  %vm63_vm2 = vcmp.ne.s32.totalorder %v14_v1, 0  ;;  %v167_v19 = vmov 0.0   ;;  %vm69_vm4 = vcmask 7168  }
   0x4   :  { %v15_v4 = vld [vmem:[%s210_s1 + $0x8] sm:$0xff]  ;;  %v121_v20 = vsel %vm63_vm2, 1.0, %v167_v19  ;;  %s168_s0 = smov [#allocation2]   ;;  %s112_s20 = sshll.u32 %s211_s2, 4  ;;  %s113_s20 = int_to_ptr.hbm [resolvable:$true] %s112_s20 }
   0x5   :  { %v21_v6 = vand.u32 127, %v20_v5  ;;  %vm64_vm3 = vcmp.ne.s32.totalorder %v15_v4, 0  ;;  %v86_v22 = vsel %vm69_vm4, %v121_v20, 0.0  ;;  %v55_v56 = vshrl.u32 %v20_v5, 7  ;;  %s110_s1 = sshll.u32 %s168_s0, 4  ;;  %s111_s1 = int_to_ptr.vmem [resolvable:$true] %s110_s1 }
   0x6   :  { %v122_v21 = vsel %vm64_vm3, 1.0, %v167_v19 }
   0x7   :  { %v87_v23 = vsel %vm69_vm4, %v122_v21, 0.0  ;;  %vm99_vm5 = vcmp.eq.s32.totalorder %v55_v56, 1  ;;  %vm98_vm6 = vcmp.eq.s32.totalorder %v55_v56, 0 }
   0x8   :  { %v88_v24 = vadd.f32 %v87_v23, %v86_v22 }
   0xa   :  { %18 = vmax.xlane.f32.xlu0 %v13_v3 }
   0xb   :  { %26 = vperm.xlu1 %130, %v15_v4  }
  0x75   :  { %v24_v7 = vpop.permute.xlu1 %23  ;;  %v17_v8 = vpop.xlane.xlu0 %16 }
  0x76   :  { %vm28_vm0 = vcmp.eq.s32.totalorder %v21_v6, %v24_v7  ;;  %v36_v9 = vsub.f32 %v12_v0, %v17_v8 }
  0x77   :  { %v30_v10 = vsel %vm28_vm0, %v12_v0, 0.0 }
  0x78   :  { %32 = vadd.xlane.f32.xlu0 %v30_v10  ;;  %v38_v11 = vmul.f32 1.442695, %v36_v9 }
  0x7a   :  { %132 = vpow2.f32 %v38_v11 }
  0x7d   :  { %v27_v12 = vpop.permute.xlu1 %26  ;;  %v19_v13 = vpop.xlane.xlu0 %18 }
  0x7e   :  { %vm29_vm1 = vcmp.eq.s32.totalorder %v21_v6, %v27_v12  ;;  %v37_v14 = vsub.f32 %v13_v3, %v19_v13 }
  0x7f   :  { %v31_v15 = vsel %vm29_vm1, %v13_v3, 0.0 }
  0x80   :  { %v133_v16 = vpop.eup %132  ;;  %v40_v17 = vmul.f32 1.442695, %v37_v14  ;;  %34 = vadd.xlane.f32.xlu1 %v31_v15  ;;  %89 = vadd.xlane.f32.xlu0 %v88_v24 }
  0x81   :  { %42 = vadd.xlane.f32.xlu2 %v133_v16 }
  0x82   :  { %134 = vpow2.f32 %v40_v17 }
  0x88   :  { %v135_v18 = vpop.eup %134 }
  0x89   :  { %44 = vadd.xlane.f32.xlu2 %v135_v18 }
  0xeb   :  { %v33_v28 = vpop.xlane.xlu0 %32 }
  0xec   :  { %v50_v30 = vsub.f32 %v33_v28, %v17_v8 }
  0xf3   :  { %v35_v31 = vpop.xlane.xlu1 %34  ;;  %v90_v42 = vpop.xlane.xlu0 %89 }
  0xf4   :  { %v43_v25 = vpop.xlane.xlu2 %42  ;;  %v51_v34 = vsub.f32 %v35_v31, %v19_v13  ;;  %v91_v43 = vrot.slane %v90_v42, 4 }
  0xf5   :  { %136 = vlog2.f32 %v43_v25 }
  0xf6   :  { %v92_v44 = vadd.f32 %v91_v43, %v90_v42 }
  0xf8   :  { %v93_v45 = vrot.slane %v92_v44, 2 }
  0xfa   :  { %v94_v49 = vadd.f32 %v93_v45, %v92_v44 }
  0xfb   :  { %v137_v26 = vpop.eup %136 }
  0xfc   :  { %v45_v27 = vpop.xlane.xlu2 %44  ;;  %v47_v29 = vmul.f32 0.6931472, %v137_v26  ;;  %v95_v52 = vrot.slane %v94_v49, 1 }
  0xfd   :  { %138 = vlog2.f32 %v45_v27 }
  0xfe   :  { %v52_v32 = vsub.f32 %v47_v29, %v50_v30  ;;  %v96_v55 = vadd.f32 %v95_v52, %v94_v49 }
 0x100   :  { %v67_v37 = vsel %vm63_vm2, %v52_v32, 0.0 }
 0x101   :  { %v70_v39 = vsel %vm69_vm4, %v67_v37, 0.0 }
 0x103   :  { %v139_v33 = vpop.eup %138 }
 0x104   :  { %v49_v35 = vmul.f32 0.6931472, %v139_v33 }
 0x106   :  { %v53_v36 = vsub.f32 %v49_v35, %v51_v34 }
 0x108   :  { %v68_v38 = vsel %vm64_vm3, %v53_v36, 0.0 }
 0x109   :  { %v71_v40 = vsel %vm69_vm4, %v68_v38, 0.0 }
 0x10a   :  { %v72_v41 = vadd.f32 %v71_v40, %v70_v39 }
 0x10c   :  { %73 = vadd.xlane.f32.xlu2 %v72_v41 }
 0x17f   :  { %v74_v46 = vpop.xlane.xlu2 %73 }
 0x180   :  { %v75_v47 = vrot.slane %v74_v46, 4 }
 0x182   :  { %v76_v48 = vadd.f32 %v75_v47, %v74_v46 }
 0x184   :  { %v77_v50 = vrot.slane %v76_v48, 2 }
 0x186   :  { %v78_v51 = vadd.f32 %v77_v50, %v76_v48 }
 0x188   :  { %v79_v53 = vrot.slane %v78_v51, 1 }
 0x18a   :  { %v80_v54 = vadd.f32 %v79_v53, %v78_v51 }
 0x18c   :  { %123 = vpush %v80_v54 }
 0x18d   :  { %125 = vpush %v96_v55 }
 0x1bd   :  { %s124_s17 = spop %123 }
 0x1be   :  { %v102_v57 = vstv %s124_s17  ;;  %s126_s21 = spop %125 }
 0x1bf   :  { %v100_v58 = vstv %s126_s21 }
 0x1c0   :  { %v101_v59 = vsel %vm99_vm5, %v100_v58, 0.0 }
 0x1c1   :  { %v103_v60 = vsel %vm98_vm6, %v102_v57, %v101_v59 }
 0x1c2   :  { %104 = vst [vmem:[#allocation2] sm:$0xff] %v103_v60 }
 0x1c3   :  { %115 = dma.vmem_to_hbm [thread:$0]  %s111_s1, 128, %s113_s20, [#allocation3]  }
 0x1c4   :  { %164 = dma.done.wait [#allocation3], 128  }
 0x1c5   :  { %165 = vsyncadd [#allocation3], 4294967168 }
 0x1c6   :  { %120 = vsyncpa [#allocation3], 1 }

</bundles_post_ra>
